<compile_context>
chip_gen: v6e
topology: v6e:2x2x1
jax: 0.10.0
libtpu: 0.0.40
codegen_flags: <defaults>
</compile_context>

<pallas_src>
import functools

import jax
import jax.numpy as jnp
from jax.experimental import pallas as pl
from jax.experimental.pallas import tpu as pltpu


DROPOUT_P = 0.2
KEEP_P = 1.0 - DROPOUT_P
LANE = 128


def _round_up(n, m):
    return ((n + m - 1) // m) * m


def _pad2d(a, rows, cols):
    return jnp.pad(a, ((0, rows - a.shape[0]), (0, cols - a.shape[1])))


def vae_kernel(latent_p,
               x_ref, eps_ref, masks_ref,
               w1e_ref, b1e_ref, w2e_ref, b2e_ref, wml_ref, bml_ref,
               w1d_ref, b1d_ref, w2d_ref, b2d_ref, w3d_ref, b3d_ref,
               xrec_ref, ml_ref):
    bf16 = jnp.bfloat16

    def linear(h, w_ref, b_ref):
        # bf16 MXU matmul with f32 accumulation, f32 bias add.
        return jnp.dot(h.astype(bf16), w_ref[...],
                       preferred_element_type=jnp.float32) + b_ref[...]

    x = x_ref[...]                                   # (bb, in_p) bf16

    # ---- Encoder ----
    h = jnp.maximum(linear(x, w1e_ref, b1e_ref), 0.0)
    h = h * masks_ref[0]                             # dropout (pre-scaled mask)
    h = jnp.maximum(linear(h, w2e_ref, b2e_ref), 0.0)
    h = h * masks_ref[1]

    # Fused mu || logvar head (ReLU as in the reference Encoder.forward).
    ml = jnp.maximum(linear(h, wml_ref, bml_ref), 0.0)   # (bb, 2*latent_p)
    mean = ml[:, :latent_p]
    logvar = ml[:, latent_p:]

    # ---- Reparameterization: z = mean + eps * exp(logvar / 2) ----
    z = mean + eps_ref[...] * jnp.exp(0.5 * logvar)

    # ---- Decoder ----
    d = jnp.maximum(linear(z, w1d_ref, b1d_ref), 0.0)
    d = d * masks_ref[2]
    d = jnp.maximum(linear(d, w2d_ref, b2d_ref), 0.0)
    d = d * masks_ref[3]
    xr = jax.nn.sigmoid(linear(d, w3d_ref, b3d_ref))

    xrec_ref[...] = xr
    ml_ref[...] = ml


def vae_forward(x, params, key, *, block_b=256):
    """x: (B, input_dim) f32. params: dict of (in,out) weights / (1,out) biases.
    key: jax PRNG key for dropout + reparameterization noise (training mode)."""
    B, input_dim = x.shape
    hidden_dim = params["w1e"].shape[1]
    latent_dim = params["wmu"].shape[1]
    output_dim = params["w3d"].shape[1]

    in_p = _round_up(input_dim, LANE)
    hid_p = _round_up(hidden_dim, LANE)
    lat_p = _round_up(latent_dim, LANE)
    out_p = _round_up(output_dim, LANE)

    bb = min(_round_up(B, 8), block_b)          # batch tile (multiple of 8)
    B_pad = _round_up(B, bb)
    n_blocks = B_pad // bb

    bf16, f32 = jnp.bfloat16, jnp.float32

    # ---- inputs: pad batch rows / feature lanes, generate randoms on host ----
    xp = _pad2d(x, B_pad, in_p).astype(bf16)

    k_eps, k_mask = jax.random.split(key)
    eps = jax.random.normal(k_eps, (B_pad, lat_p), dtype=f32)
    keep = jax.random.bernoulli(k_mask, KEEP_P, (4, B_pad, hid_p))
    masks = keep.astype(f32) * (1.0 / KEEP_P)   # pre-scaled dropout masks

    # ---- weights: zero-pad to 128 multiples, bf16 matmul operands ----
    w1e = _pad2d(params["w1e"], in_p, hid_p).astype(bf16)
    b1e = _pad2d(params["b1e"], 1, hid_p).astype(f32)
    w2e = _pad2d(params["w2e"], hid_p, hid_p).astype(bf16)
    b2e = _pad2d(params["b2e"], 1, hid_p).astype(f32)
    wml = jnp.concatenate([_pad2d(params["wmu"], hid_p, lat_p),
                           _pad2d(params["wlv"], hid_p, lat_p)], axis=1).astype(bf16)
    bml = jnp.concatenate([_pad2d(params["bmu"], 1, lat_p),
                           _pad2d(params["blv"], 1, lat_p)], axis=1).astype(f32)
    w1d = _pad2d(params["w1d"], lat_p, hid_p).astype(bf16)
    b1d = _pad2d(params["b1d"], 1, hid_p).astype(f32)
    w2d = _pad2d(params["w2d"], hid_p, hid_p).astype(bf16)
    b2d = _pad2d(params["b2d"], 1, hid_p).astype(f32)
    w3d = _pad2d(params["w3d"], hid_p, out_p).astype(bf16)
    b3d = _pad2d(params["b3d"], 1, out_p).astype(f32)

    def row_spec(feat):
        return pl.BlockSpec((bb, feat), lambda i: (i, 0))

    def const_spec(shape):
        return pl.BlockSpec(shape, lambda i, _n=len(shape): (0,) * _n)

    in_specs = [
        row_spec(in_p),                                      # x
        row_spec(lat_p),                                     # eps
        pl.BlockSpec((4, bb, hid_p), lambda i: (0, i, 0)),   # dropout masks
        const_spec(w1e.shape), const_spec(b1e.shape),
        const_spec(w2e.shape), const_spec(b2e.shape),
        const_spec(wml.shape), const_spec(bml.shape),
        const_spec(w1d.shape), const_spec(b1d.shape),
        const_spec(w2d.shape), const_spec(b2d.shape),
        const_spec(w3d.shape), const_spec(b3d.shape),
    ]
    out_specs = (row_spec(out_p), row_spec(2 * lat_p))
    out_shape = (jax.ShapeDtypeStruct((B_pad, out_p), f32),
                 jax.ShapeDtypeStruct((B_pad, 2 * lat_p), f32))

    flops = 2 * B_pad * (in_p * hid_p + 2 * hid_p * hid_p + hid_p * 2 * lat_p
                         + lat_p * hid_p + hid_p * out_p)
    transcendentals = B_pad * (lat_p + out_p)               # exp + sigmoid
    weight_bytes = sum(int(a.size) * a.dtype.itemsize
                       for a in (w1e, b1e, w2e, b2e, wml, bml,
                                 w1d, b1d, w2d, b2d, w3d, b3d))
    io_bytes = sum(int(a.size) * a.dtype.itemsize for a in (xp, eps, masks))
    io_bytes += B_pad * (out_p + 2 * lat_p) * 4
    cost = pl.CostEstimate(flops=flops, transcendentals=transcendentals,
                           bytes_accessed=weight_bytes + io_bytes)

    kernel = functools.partial(vae_kernel, lat_p)
    xrec_pad, ml_pad = pl.pallas_call(
        kernel,
        grid=(n_blocks,),
        in_specs=in_specs,
        out_specs=out_specs,
        out_shape=out_shape,
        compiler_params=pltpu.CompilerParams(
            dimension_semantics=("parallel",),
            vmem_limit_bytes=32 * 1024 * 1024),
        cost_estimate=cost,
    )(xp, eps, masks, w1e, b1e, w2e, b2e, wml, bml,
      w1d, b1d, w2d, b2d, w3d, b3d)

    x_reconst = xrec_pad[:B, :output_dim]
    mean = ml_pad[:B, :latent_dim]
    logvar = ml_pad[:B, lat_p:lat_p + latent_dim]
    return x_reconst, mean, logvar


def init_params(key, input_dim, hidden_dim, latent_dim, output_dim):
    """Deterministic synthetic init (torch-Linear-like uniform scale)."""
    def linear(k, fan_in, fan_out):
        kw, kb = jax.random.split(k)
        lim = 1.0 / jnp.sqrt(fan_in)
        w = jax.random.uniform(kw, (fan_in, fan_out), jnp.float32, -lim, lim)
        b = jax.random.uniform(kb, (1, fan_out), jnp.float32, -lim, lim)
        return w, b

    ks = jax.random.split(key, 7)
    p = {}
    p["w1e"], p["b1e"] = linear(ks[0], input_dim, hidden_dim)
    p["w2e"], p["b2e"] = linear(ks[1], hidden_dim, hidden_dim)
    p["wmu"], p["bmu"] = linear(ks[2], hidden_dim, latent_dim)
    p["wlv"], p["blv"] = linear(ks[3], hidden_dim, latent_dim)
    p["w1d"], p["b1d"] = linear(ks[4], latent_dim, hidden_dim)
    p["w2d"], p["b2d"] = linear(ks[5], hidden_dim, hidden_dim)
    p["w3d"], p["b3d"] = linear(ks[6], hidden_dim, output_dim)
    return p


if __name__ == "__main__":
    B, input_dim, hidden_dim, latent_dim = 8, 64, 32, 16
    output_dim = input_dim

    key = jax.random.PRNGKey(0)
    kx, kp, kr = jax.random.split(key, 3)
    x = jax.random.normal(kx, (B, input_dim), dtype=jnp.float32)
    params = init_params(kp, input_dim, hidden_dim, latent_dim, output_dim)

    x_reconst, mean, logvar = vae_forward(x, params, kr)
    jax.block_until_ready((x_reconst, mean, logvar))

    assert x_reconst.shape == (B, output_dim)
    assert mean.shape == (B, latent_dim)
    assert logvar.shape == (B, latent_dim)
    assert bool(jnp.all(jnp.isfinite(x_reconst)))
    assert bool(jnp.all((x_reconst >= 0.0) & (x_reconst <= 1.0)))
    assert bool(jnp.all(mean >= 0.0)) and bool(jnp.all(logvar >= 0.0))

    print("KERNEL_OK")
</pallas_src>

<mosaic_0001>
module attributes {stable_mosaic.version = 11 : i64} {
  func.func @vae_kernel(%arg0: i32, %arg1: memref<8x128xbf16, #tpu.memory_space<vmem>>, %arg2: memref<8x128xf32, #tpu.memory_space<vmem>>, %arg3: memref<4x8x128xf32, #tpu.memory_space<vmem>>, %arg4: memref<128x128xbf16, #tpu.memory_space<vmem>>, %arg5: memref<1x128xf32, #tpu.memory_space<vmem>>, %arg6: memref<128x128xbf16, #tpu.memory_space<vmem>>, %arg7: memref<1x128xf32, #tpu.memory_space<vmem>>, %arg8: memref<128x256xbf16, #tpu.memory_space<vmem>>, %arg9: memref<1x256xf32, #tpu.memory_space<vmem>>, %arg10: memref<128x128xbf16, #tpu.memory_space<vmem>>, %arg11: memref<1x128xf32, #tpu.memory_space<vmem>>, %arg12: memref<128x128xbf16, #tpu.memory_space<vmem>>, %arg13: memref<1x128xf32, #tpu.memory_space<vmem>>, %arg14: memref<128x128xbf16, #tpu.memory_space<vmem>>, %arg15: memref<1x128xf32, #tpu.memory_space<vmem>>, %arg16: memref<8x128xf32, #tpu.memory_space<vmem>>, %arg17: memref<8x256xf32, #tpu.memory_space<vmem>>) attributes {dimension_semantics = [#tpu.dimension_semantics<parallel>], iteration_bounds = array<i64: 1>, scalar_prefetch = 0 : i64, scratch_operands = 0 : i64, tpu.core_type = #tpu.core_type<tc>, window_params = [{transform_indices = @transform_0, window_bounds = array<i64: 8, 128>}, {transform_indices = @transform_1, window_bounds = array<i64: 8, 128>}, {transform_indices = @transform_2, window_bounds = array<i64: 4, 8, 128>}, {pipeline_mode = #tpu.pipeline_mode<synchronous>, transform_indices = @transform_3, window_bounds = array<i64: 128, 128>}, {pipeline_mode = #tpu.pipeline_mode<synchronous>, transform_indices = @transform_4, window_bounds = array<i64: 1, 128>}, {pipeline_mode = #tpu.pipeline_mode<synchronous>, transform_indices = @transform_5, window_bounds = array<i64: 128, 128>}, {pipeline_mode = #tpu.pipeline_mode<synchronous>, transform_indices = @transform_6, window_bounds = array<i64: 1, 128>}, {pipeline_mode = #tpu.pipeline_mode<synchronous>, transform_indices = @transform_7, window_bounds = array<i64: 128, 256>}, {pipeline_mode = #tpu.pipeline_mode<synchronous>, transform_indices = @transform_8, window_bounds = array<i64: 1, 256>}, {pipeline_mode = #tpu.pipeline_mode<synchronous>, transform_indices = @transform_9, window_bounds = array<i64: 128, 128>}, {pipeline_mode = #tpu.pipeline_mode<synchronous>, transform_indices = @transform_10, window_bounds = array<i64: 1, 128>}, {pipeline_mode = #tpu.pipeline_mode<synchronous>, transform_indices = @transform_11, window_bounds = array<i64: 128, 128>}, {pipeline_mode = #tpu.pipeline_mode<synchronous>, transform_indices = @transform_12, window_bounds = array<i64: 1, 128>}, {pipeline_mode = #tpu.pipeline_mode<synchronous>, transform_indices = @transform_13, window_bounds = array<i64: 128, 128>}, {pipeline_mode = #tpu.pipeline_mode<synchronous>, transform_indices = @transform_14, window_bounds = array<i64: 1, 128>}, {transform_indices = @transform_15, window_bounds = array<i64: 8, 128>}, {transform_indices = @transform_16, window_bounds = array<i64: 8, 256>}]} {
    %c0 = arith.constant 0 : index
    %c0_0 = arith.constant 0 : index
    %0 = vector.load %arg1[%c0, %c0_0] : memref<8x128xbf16, #tpu.memory_space<vmem>>, vector<8x128xbf16>
    %c0_1 = arith.constant 0 : index
    %c0_2 = arith.constant 0 : index
    %1 = vector.load %arg4[%c0_1, %c0_2] : memref<128x128xbf16, #tpu.memory_space<vmem>>, vector<128x128xbf16>
    %cst = arith.constant dense<0.000000e+00> : vector<8x128xf32>
    %2 = tpu.matmul %0, %1, %cst {dimension_numbers = #tpu.dot_dimension_numbers<[1], [0], [0], [1], [0, 0, 1, 1], [], []>} : vector<8x128xbf16>, vector<128x128xbf16>, vector<8x128xf32> -> vector<8x128xf32>
    %c0_3 = arith.constant 0 : index
    %c0_4 = arith.constant 0 : index
    %3 = vector.load %arg5[%c0_3, %c0_4] : memref<1x128xf32, #tpu.memory_space<vmem>>, vector<1x128xf32>
    %4 = vector.broadcast %3 : vector<1x128xf32> to vector<8x128xf32>
    %5 = arith.addf %2, %4 : vector<8x128xf32>
    %cst_5 = arith.constant 0.000000e+00 : f32
    %6 = vector.broadcast %cst_5 : f32 to vector<8x128xf32>
    %7 = arith.maximumf %5, %6 : vector<8x128xf32>
    %c0_6 = arith.constant 0 : index
    %c0_7 = arith.constant 0 : index
    %c0_8 = arith.constant 0 : index
    %8 = vector.load %arg3[%c0_6, %c0_7, %c0_8] : memref<4x8x128xf32, #tpu.memory_space<vmem>>, vector<1x8x128xf32>
    %9 = vector.shape_cast %8 : vector<1x8x128xf32> to vector<8x128xf32>
    %10 = arith.mulf %7, %9 : vector<8x128xf32>
    %11 = arith.truncf %10 : vector<8x128xf32> to vector<8x128xbf16>
    %c0_9 = arith.constant 0 : index
    %c0_10 = arith.constant 0 : index
    %12 = vector.load %arg6[%c0_9, %c0_10] : memref<128x128xbf16, #tpu.memory_space<vmem>>, vector<128x128xbf16>
    %cst_11 = arith.constant dense<0.000000e+00> : vector<8x128xf32>
    %13 = tpu.matmul %11, %12, %cst_11 {dimension_numbers = #tpu.dot_dimension_numbers<[1], [0], [0], [1], [0, 0, 1, 1], [], []>} : vector<8x128xbf16>, vector<128x128xbf16>, vector<8x128xf32> -> vector<8x128xf32>
    %c0_12 = arith.constant 0 : index
    %c0_13 = arith.constant 0 : index
    %14 = vector.load %arg7[%c0_12, %c0_13] : memref<1x128xf32, #tpu.memory_space<vmem>>, vector<1x128xf32>
    %15 = vector.broadcast %14 : vector<1x128xf32> to vector<8x128xf32>
    %16 = arith.addf %13, %15 : vector<8x128xf32>
    %cst_14 = arith.constant 0.000000e+00 : f32
    %17 = vector.broadcast %cst_14 : f32 to vector<8x128xf32>
    %18 = arith.maximumf %16, %17 : vector<8x128xf32>
    %c1 = arith.constant 1 : index
    %c0_15 = arith.constant 0 : index
    %c0_16 = arith.constant 0 : index
    %19 = vector.load %arg3[%c1, %c0_15, %c0_16] : memref<4x8x128xf32, #tpu.memory_space<vmem>>, vector<1x8x128xf32>
    %20 = vector.shape_cast %19 : vector<1x8x128xf32> to vector<8x128xf32>
    %21 = arith.mulf %18, %20 : vector<8x128xf32>
    %22 = arith.truncf %21 : vector<8x128xf32> to vector<8x128xbf16>
    %c0_17 = arith.constant 0 : index
    %c0_18 = arith.constant 0 : index
    %23 = vector.load %arg8[%c0_17, %c0_18] : memref<128x256xbf16, #tpu.memory_space<vmem>>, vector<128x256xbf16>
    %cst_19 = arith.constant dense<0.000000e+00> : vector<8x256xf32>
    %24 = tpu.matmul %22, %23, %cst_19 {dimension_numbers = #tpu.dot_dimension_numbers<[1], [0], [0], [1], [0, 0, 1, 1], [], []>} : vector<8x128xbf16>, vector<128x256xbf16>, vector<8x256xf32> -> vector<8x256xf32>
    %c0_20 = arith.constant 0 : index
    %c0_21 = arith.constant 0 : index
    %25 = vector.load %arg9[%c0_20, %c0_21] : memref<1x256xf32, #tpu.memory_space<vmem>>, vector<1x256xf32>
    %26 = vector.broadcast %25 : vector<1x256xf32> to vector<8x256xf32>
    %27 = arith.addf %24, %26 : vector<8x256xf32>
    %cst_22 = arith.constant 0.000000e+00 : f32
    %28 = vector.broadcast %cst_22 : f32 to vector<8x256xf32>
    %29 = arith.maximumf %27, %28 : vector<8x256xf32>
    %30 = vector.extract_strided_slice %29 {offsets = [0, 0], sizes = [8, 128], strides = [1, 1]} : vector<8x256xf32> to vector<8x128xf32>
    %31 = vector.extract_strided_slice %29 {offsets = [0, 128], sizes = [8, 128], strides = [1, 1]} : vector<8x256xf32> to vector<8x128xf32>
    %c0_23 = arith.constant 0 : index
    %c0_24 = arith.constant 0 : index
    %32 = vector.load %arg2[%c0_23, %c0_24] : memref<8x128xf32, #tpu.memory_space<vmem>>, vector<8x128xf32>
    %cst_25 = arith.constant 5.000000e-01 : f32
    %33 = vector.broadcast %cst_25 : f32 to vector<8x128xf32>
    %34 = arith.mulf %33, %31 : vector<8x128xf32>
    %35 = math.exp %34 : vector<8x128xf32>
    %36 = arith.mulf %32, %35 : vector<8x128xf32>
    %37 = arith.addf %30, %36 : vector<8x128xf32>
    %38 = arith.truncf %37 : vector<8x128xf32> to vector<8x128xbf16>
    %c0_26 = arith.constant 0 : index
    %c0_27 = arith.constant 0 : index
    %39 = vector.load %arg10[%c0_26, %c0_27] : memref<128x128xbf16, #tpu.memory_space<vmem>>, vector<128x128xbf16>
    %cst_28 = arith.constant dense<0.000000e+00> : vector<8x128xf32>
    %40 = tpu.matmul %38, %39, %cst_28 {dimension_numbers = #tpu.dot_dimension_numbers<[1], [0], [0], [1], [0, 0, 1, 1], [], []>} : vector<8x128xbf16>, vector<128x128xbf16>, vector<8x128xf32> -> vector<8x128xf32>
    %c0_29 = arith.constant 0 : index
    %c0_30 = arith.constant 0 : index
    %41 = vector.load %arg11[%c0_29, %c0_30] : memref<1x128xf32, #tpu.memory_space<vmem>>, vector<1x128xf32>
    %42 = vector.broadcast %41 : vector<1x128xf32> to vector<8x128xf32>
    %43 = arith.addf %40, %42 : vector<8x128xf32>
    %cst_31 = arith.constant 0.000000e+00 : f32
    %44 = vector.broadcast %cst_31 : f32 to vector<8x128xf32>
    %45 = arith.maximumf %43, %44 : vector<8x128xf32>
    %c2 = arith.constant 2 : index
    %c0_32 = arith.constant 0 : index
    %c0_33 = arith.constant 0 : index
    %46 = vector.load %arg3[%c2, %c0_32, %c0_33] : memref<4x8x128xf32, #tpu.memory_space<vmem>>, vector<1x8x128xf32>
    %47 = vector.shape_cast %46 : vector<1x8x128xf32> to vector<8x128xf32>
    %48 = arith.mulf %45, %47 : vector<8x128xf32>
    %49 = arith.truncf %48 : vector<8x128xf32> to vector<8x128xbf16>
    %c0_34 = arith.constant 0 : index
    %c0_35 = arith.constant 0 : index
    %50 = vector.load %arg12[%c0_34, %c0_35] : memref<128x128xbf16, #tpu.memory_space<vmem>>, vector<128x128xbf16>
    %cst_36 = arith.constant dense<0.000000e+00> : vector<8x128xf32>
    %51 = tpu.matmul %49, %50, %cst_36 {dimension_numbers = #tpu.dot_dimension_numbers<[1], [0], [0], [1], [0, 0, 1, 1], [], []>} : vector<8x128xbf16>, vector<128x128xbf16>, vector<8x128xf32> -> vector<8x128xf32>
    %c0_37 = arith.constant 0 : index
    %c0_38 = arith.constant 0 : index
    %52 = vector.load %arg13[%c0_37, %c0_38] : memref<1x128xf32, #tpu.memory_space<vmem>>, vector<1x128xf32>
    %53 = vector.broadcast %52 : vector<1x128xf32> to vector<8x128xf32>
    %54 = arith.addf %51, %53 : vector<8x128xf32>
    %cst_39 = arith.constant 0.000000e+00 : f32
    %55 = vector.broadcast %cst_39 : f32 to vector<8x128xf32>
    %56 = arith.maximumf %54, %55 : vector<8x128xf32>
    %c3 = arith.constant 3 : index
    %c0_40 = arith.constant 0 : index
    %c0_41 = arith.constant 0 : index
    %57 = vector.load %arg3[%c3, %c0_40, %c0_41] : memref<4x8x128xf32, #tpu.memory_space<vmem>>, vector<1x8x128xf32>
    %58 = vector.shape_cast %57 : vector<1x8x128xf32> to vector<8x128xf32>
    %59 = arith.mulf %56, %58 : vector<8x128xf32>
    %60 = arith.truncf %59 : vector<8x128xf32> to vector<8x128xbf16>
    %c0_42 = arith.constant 0 : index
    %c0_43 = arith.constant 0 : index
    %61 = vector.load %arg14[%c0_42, %c0_43] : memref<128x128xbf16, #tpu.memory_space<vmem>>, vector<128x128xbf16>
    %cst_44 = arith.constant dense<0.000000e+00> : vector<8x128xf32>
    %62 = tpu.matmul %60, %61, %cst_44 {dimension_numbers = #tpu.dot_dimension_numbers<[1], [0], [0], [1], [0, 0, 1, 1], [], []>} : vector<8x128xbf16>, vector<128x128xbf16>, vector<8x128xf32> -> vector<8x128xf32>
    %c0_45 = arith.constant 0 : index
    %c0_46 = arith.constant 0 : index
    %63 = vector.load %arg15[%c0_45, %c0_46] : memref<1x128xf32, #tpu.memory_space<vmem>>, vector<1x128xf32>
    %64 = vector.broadcast %63 : vector<1x128xf32> to vector<8x128xf32>
    %65 = arith.addf %62, %64 : vector<8x128xf32>
    %66 = arith.negf %65 : vector<8x128xf32>
    %67 = math.exp %66 : vector<8x128xf32>
    %cst_47 = arith.constant 1.000000e+00 : f32
    %68 = vector.broadcast %cst_47 : f32 to vector<8x128xf32>
    %69 = arith.addf %68, %67 : vector<8x128xf32>
    %70 = arith.divf %68, %69 : vector<8x128xf32>
    %c0_48 = arith.constant 0 : index
    %c0_49 = arith.constant 0 : index
    %71 = vector.load %arg16[%c0_48, %c0_49] : memref<8x128xf32, #tpu.memory_space<vmem>>, vector<8x128xf32>
    tpu.vector_store %arg16[%c0_48, %c0_49], %70 {strides = array<i32>} : memref<8x128xf32, #tpu.memory_space<vmem>>, vector<8x128xf32>,
    %c0_50 = arith.constant 0 : index
    %c0_51 = arith.constant 0 : index
    %72 = vector.load %arg17[%c0_50, %c0_51] : memref<8x256xf32, #tpu.memory_space<vmem>>, vector<8x256xf32>
    tpu.vector_store %arg17[%c0_50, %c0_51], %29 {strides = array<i32>} : memref<8x256xf32, #tpu.memory_space<vmem>>, vector<8x256xf32>,
    return
  }
  func.func @transform_0(%arg0: i32) -> (i32, i32) {
    %c0_i32 = arith.constant 0 : i32
    %c0_i32_0 = arith.constant 0 : i32
    return %arg0, %c0_i32 : i32, i32
  }
  func.func @transform_1(%arg0: i32) -> (i32, i32) {
    %c0_i32 = arith.constant 0 : i32
    %c0_i32_0 = arith.constant 0 : i32
    return %arg0, %c0_i32 : i32, i32
  }
  func.func @transform_2(%arg0: i32) -> (i32, i32, i32) {
    %c0_i32 = arith.constant 0 : i32
    %c0_i32_0 = arith.constant 0 : i32
    %c0_i32_1 = arith.constant 0 : i32
    return %c0_i32, %arg0, %c0_i32_0 : i32, i32, i32
  }
  func.func @transform_3(%arg0: i32) -> (i32, i32) {
    %c0_i32 = arith.constant 0 : i32
    %c0_i32_0 = arith.constant 0 : i32
    %c0_i32_1 = arith.constant 0 : i32
    return %c0_i32, %c0_i32_0 : i32, i32
  }
  func.func @transform_4(%arg0: i32) -> (i32, i32) {
    %c0_i32 = arith.constant 0 : i32
    %c0_i32_0 = arith.constant 0 : i32
    %c0_i32_1 = arith.constant 0 : i32
    return %c0_i32, %c0_i32_0 : i32, i32
  }
  func.func @transform_5(%arg0: i32) -> (i32, i32) {
    %c0_i32 = arith.constant 0 : i32
    %c0_i32_0 = arith.constant 0 : i32
    %c0_i32_1 = arith.constant 0 : i32
    return %c0_i32, %c0_i32_0 : i32, i32
  }
  func.func @transform_6(%arg0: i32) -> (i32, i32) {
    %c0_i32 = arith.constant 0 : i32
    %c0_i32_0 = arith.constant 0 : i32
    %c0_i32_1 = arith.constant 0 : i32
    return %c0_i32, %c0_i32_0 : i32, i32
  }
  func.func @transform_7(%arg0: i32) -> (i32, i32) {
    %c0_i32 = arith.constant 0 : i32
    %c0_i32_0 = arith.constant 0 : i32
    %c0_i32_1 = arith.constant 0 : i32
    return %c0_i32, %c0_i32_0 : i32, i32
  }
  func.func @transform_8(%arg0: i32) -> (i32, i32) {
    %c0_i32 = arith.constant 0 : i32
    %c0_i32_0 = arith.constant 0 : i32
    %c0_i32_1 = arith.constant 0 : i32
    return %c0_i32, %c0_i32_0 : i32, i32
  }
  func.func @transform_9(%arg0: i32) -> (i32, i32) {
    %c0_i32 = arith.constant 0 : i32
    %c0_i32_0 = arith.constant 0 : i32
    %c0_i32_1 = arith.constant 0 : i32
    return %c0_i32, %c0_i32_0 : i32, i32
  }
  func.func @transform_10(%arg0: i32) -> (i32, i32) {
    %c0_i32 = arith.constant 0 : i32
    %c0_i32_0 = arith.constant 0 : i32
    %c0_i32_1 = arith.constant 0 : i32
    return %c0_i32, %c0_i32_0 : i32, i32
  }
  func.func @transform_11(%arg0: i32) -> (i32, i32) {
    %c0_i32 = arith.constant 0 : i32
    %c0_i32_0 = arith.constant 0 : i32
    %c0_i32_1 = arith.constant 0 : i32
    return %c0_i32, %c0_i32_0 : i32, i32
  }
  func.func @transform_12(%arg0: i32) -> (i32, i32) {
    %c0_i32 = arith.constant 0 : i32
    %c0_i32_0 = arith.constant 0 : i32
    %c0_i32_1 = arith.constant 0 : i32
    return %c0_i32, %c0_i32_0 : i32, i32
  }
  func.func @transform_13(%arg0: i32) -> (i32, i32) {
    %c0_i32 = arith.constant 0 : i32
    %c0_i32_0 = arith.constant 0 : i32
    %c0_i32_1 = arith.constant 0 : i32
    return %c0_i32, %c0_i32_0 : i32, i32
  }
  func.func @transform_14(%arg0: i32) -> (i32, i32) {
    %c0_i32 = arith.constant 0 : i32
    %c0_i32_0 = arith.constant 0 : i32
    %c0_i32_1 = arith.constant 0 : i32
    return %c0_i32, %c0_i32_0 : i32, i32
  }
  func.func @transform_15(%arg0: i32) -> (i32, i32) {
    %c0_i32 = arith.constant 0 : i32
    %c0_i32_0 = arith.constant 0 : i32
    return %arg0, %c0_i32 : i32, i32
  }
  func.func @transform_16(%arg0: i32) -> (i32, i32) {
    %c0_i32 = arith.constant 0 : i32
    %c0_i32_0 = arith.constant 0 : i32
    return %arg0, %c0_i32 : i32, i32
  }
}

</mosaic_0001>

<bundles_post_ra>
// kernel: tpu_custom_call.1
= control target key start
LH: loop header
LB: loop body
LE: loop exit
PB: predicated region body
PF: predicated region fallthrough
CT: control target
= control target key end

     0   :  { %s1702_s0 = inlined_call_operand.hbm [shape: bf16[8,128], index: 0, kind: input, shape index: {}]   ;;  %s1703_s1 = inlined_call_operand.hbm [shape: f32[8,128], index: 1, kind: input, shape index: {}]   ;;  %s1704_s2 = inlined_call_operand.hbm [shape: f32[4,8,128], index: 2, kind: input, shape index: {}]   ;;  %s1705_s3 = inlined_call_operand.hbm [shape: bf16[128,128], index: 3, kind: input, shape index: {}]   ;;  %s1706_s4 = inlined_call_operand.vmem [shape: f32[1,128], index: 4, kind: input, shape index: {}]   ;;  %s1707_s5 = inlined_call_operand.hbm [shape: bf16[128,128], index: 5, kind: input, shape index: {}]   ;;  %s1708_s6 = inlined_call_operand.vmem [shape: f32[1,128], index: 6, kind: input, shape index: {}]   ;;  %s1709_s7 = inlined_call_operand.hbm [shape: bf16[128,256], index: 7, kind: input, shape index: {}]   ;;  %s1710_s8 = inlined_call_operand.vmem [shape: f32[1,256], index: 8, kind: input, shape index: {}]   ;;  %s1711_s9 = inlined_call_operand.hbm [shape: bf16[128,128], index: 9, kind: input, shape index: {}]   ;;  %s1712_s10 = inlined_call_operand.vmem [shape: f32[1,128], index: 10, kind: input, shape index: {}]   ;;  %s1713_s11 = inlined_call_operand.hbm [shape: bf16[128,128], index: 11, kind: input, shape index: {}]   ;;  %s1714_s12 = inlined_call_operand.vmem [shape: f32[1,128], index: 12, kind: input, shape index: {}]   ;;  %s1715_s13 = inlined_call_operand.hbm [shape: bf16[128,128], index: 13, kind: input, shape index: {}]   ;;  %s1716_s14 = inlined_call_operand.vmem [shape: f32[1,128], index: 14, kind: input, shape index: {}]   ;;  %s1717_s15 = inlined_call_operand.hbm [shape: f32[8,128], index: 15, kind: output, shape index: {0}]   ;;  %s1718_s16 = inlined_call_operand.hbm [shape: f32[8,256], index: 16, kind: output, shape index: {1}]  }
   0x1   :  { %1719 = sst [smem:[#allocation27_spill]] %s1702_s0 }
   0x2   :  { %22 = vsyncpa [#allocation3], 0 }
   0x3   :  { %23 = vsyncpa [#allocation6], 0 }
   0x4   :  { %24 = vsyncpa [#allocation9], 0 }
   0x5   :  { %25 = vsyncpa [#allocation12], 0 }
   0x6   :  { %26 = vsyncpa [#allocation15], 0 }
   0x7   :  { %27 = vsyncpa [#allocation4], 0 }
   0x8   :  { %28 = vsyncpa [#allocation19], 0  ;;  %s1477_s21 = smov [#allocation5]   ;;  %s1478_s23 = smov [#allocation8]  }
   0x9   :  { %s45_s22 = sshll.u32 %s1477_s21, 4  ;;  %s66_s24 = sshll.u32 %s1478_s23, 4  ;;  %s46_s22 = int_to_ptr.vmem [resolvable:$true] %s45_s22  ;;  %s67_s24 = int_to_ptr.vmem [resolvable:$true] %s66_s24 }
   0xa   :  { %s1251_s25 = scalar_lea.vmem %s46_s22, 128  ;;  %p1256_p1 = scmp.lt.s32.totalorder %s46_s22, %s46_s22 }
   0xb   :  { %p1252_p0 = scmp.ne.s32.totalorder %s46_s22, %s1251_s25  ;;  %p1257_p2 = scmp.lt.s32.totalorder %s1251_s25, %s1251_s25 }
   0xd   :  { %p1258_p3 = por %p1257_p2, %p1256_p1 }
   0xf   :  { %p1259_p4 = pnand %p1258_p3, %p1252_p0 }
  0x11   :  { %1262 = shalt.err (!%p1259_p4)
}
  0x12   :  { %48 = dma.hbm_to_vmem [thread:$0]  %s1703_s1, 128, %s46_s22, [#allocation6]  }
  0x13   :  { %s1271_s28 = scalar_lea.vmem %s67_s24, 1024  ;;  %p1276_p6 = scmp.lt.s32.totalorder %s67_s24, %s67_s24 }
  0x14   :  { %p1272_p5 = scmp.ne.s32.totalorder %s67_s24, %s1271_s28  ;;  %p1277_p7 = scmp.lt.s32.totalorder %s1271_s28, %s1271_s28 }
  0x16   :  { %p1278_p8 = por %p1277_p7, %p1276_p6 }
  0x18   :  { %p1279_p9 = pnand %p1278_p8, %p1272_p5 }
  0x1a   :  { %1282 = shalt.err (!%p1279_p9)
}
  0x1b   :  { %s1479_s29 = smov 64   ;;  %s1480_s30 = smov 4  }
  0x1c   :  { %72 = dma.hbm_to_vmem [thread:$0]  %s1705_s3, 1024, %s67_s24, [#allocation9], %s1479_s29, %s1479_s29, %s1480_s30  }
  0x1d   :  { %s1481_s18 = smov [#allocation11]   ;;  %s1482_s20 = smov [#allocation14]  }
  0x1e   :  { %s94_s19 = sshll.u32 %s1481_s18, 4  ;;  %s122_s1 = sshll.u32 %s1482_s20, 4  ;;  %s95_s19 = int_to_ptr.vmem [resolvable:$true] %s94_s19  ;;  %s123_s1 = int_to_ptr.vmem [resolvable:$true] %s122_s1 }
  0x1f   :  { %s1291_s21 = scalar_lea.vmem %s95_s19, 2048  ;;  %p1296_p11 = scmp.lt.s32.totalorder %s95_s19, %s95_s19 }
  0x20   :  { %p1292_p10 = scmp.ne.s32.totalorder %s95_s19, %s1291_s21  ;;  %p1297_p12 = scmp.lt.s32.totalorder %s1291_s21, %s1291_s21 }
  0x22   :  { %p1298_p13 = por %p1297_p12, %p1296_p11 }
  0x24   :  { %p1299_p0 = pnand %p1298_p13, %p1292_p10 }
  0x26   :  { %1302 = shalt.err (!%p1299_p0)
}
  0x27   :  { %s1483_s22 = smov 128   ;;  %s1484_s23 = smov 8  }
  0x28   :  { %100 = dma.hbm_to_vmem [thread:$0]  %s1709_s7, 2048, %s95_s19, [#allocation12], %s1483_s22, %s1483_s22, %s1484_s23  }
  0x29   :  { %s1311_s24 = scalar_lea.vmem %s123_s1, 1024  ;;  %p1316_p2 = scmp.lt.s32.totalorder %s123_s1, %s123_s1 }
  0x2a   :  { %p1312_p1 = scmp.ne.s32.totalorder %s123_s1, %s1311_s24  ;;  %p1317_p3 = scmp.lt.s32.totalorder %s1311_s24, %s1311_s24 }
  0x2c   :  { %p1318_p4 = por %p1317_p3, %p1316_p2 }
  0x2e   :  { %p1319_p5 = pnand %p1318_p4, %p1312_p1 }
  0x30   :  { %1322 = shalt.err (!%p1319_p5)
}
  0x31   :  { %128 = dma.hbm_to_vmem [thread:$0]  %s1713_s11, 1024, %s123_s1, [#allocation15], %s1479_s29, %s1479_s29, %s1480_s30  }
  0x32   :  { %s1485_s28 = smov [#allocation2]   ;;  %s1486_s17 = smov [#allocation7]  }
  0x33   :  { %s35_s0 = sshll.u32 %s1485_s28, 4  ;;  %s54_s18 = sshll.u32 %s1486_s17, 4  ;;  %s36_s0 = int_to_ptr.vmem [resolvable:$true] %s35_s0  ;;  %s55_s18 = int_to_ptr.vmem [resolvable:$true] %s54_s18 }
  0x34   :  { %s1331_s7 = scalar_lea.vmem %s36_s0, 64  ;;  %p1336_p7 = scmp.lt.s32.totalorder %s36_s0, %s36_s0 }
  0x35   :  { %p1332_p6 = scmp.ne.s32.totalorder %s36_s0, %s1331_s7  ;;  %p1337_p8 = scmp.lt.s32.totalorder %s1331_s7, %s1331_s7 }
  0x37   :  { %p1338_p9 = por %p1337_p8, %p1336_p7 }
  0x39   :  { %p1339_p10 = pnand %p1338_p9, %p1332_p6 }
  0x3b   :  { %1342 = shalt.err (!%p1339_p10)
}
  0x3c   :  { %s1720_s21 = sld [smem:[#allocation27_spill]]  ;;  %s1351_s25 = scalar_lea.vmem %s55_s18, 512 }
  0x3d   :  { %p1352_p11 = scmp.ne.s32.totalorder %s55_s18, %s1351_s25  ;;  %p1356_p12 = scmp.lt.s32.totalorder %s55_s18, %s55_s18 }
  0x3e   :  { %p1357_p13 = scmp.lt.s32.totalorder %s1351_s25, %s1351_s25 }
  0x40   :  { %p1358_p0 = por %p1357_p13, %p1356_p12 }
  0x42   :  { %38 = dma.hbm_to_vmem [thread:$0]  %s1720_s21, 64, %s36_s0, [#allocation3]  }
  0x43   :  { %p1359_p1 = pnand %p1358_p0, %p1352_p11 }
  0x45   :  { %1362 = shalt.err (!%p1359_p1)
}
  0x46   :  { %60 = dma.hbm_to_vmem [thread:$0]  %s1704_s2, 512, %s55_s18, [#allocation6], %s1483_s22, %s1483_s22, %s1484_s23  }
  0x47   :  { %s1487_s3 = smov [#allocation10]   ;;  %s1488_s26 = smov [#allocation13]  }
  0x48   :  { %s80_s24 = sshll.u32 %s1487_s3, 4  ;;  %s108_s27 = sshll.u32 %s1488_s26, 4  ;;  %s81_s24 = int_to_ptr.vmem [resolvable:$true] %s80_s24  ;;  %s109_s27 = int_to_ptr.vmem [resolvable:$true] %s108_s27 }
  0x49   :  { %s1371_s28 = scalar_lea.vmem %s81_s24, 1024  ;;  %p1376_p3 = scmp.lt.s32.totalorder %s81_s24, %s81_s24 }
  0x4a   :  { %p1372_p2 = scmp.ne.s32.totalorder %s81_s24, %s1371_s28  ;;  %p1377_p4 = scmp.lt.s32.totalorder %s1371_s28, %s1371_s28 }
  0x4c   :  { %p1378_p5 = por %p1377_p4, %p1376_p3 }
  0x4e   :  { %p1379_p6 = pnand %p1378_p5, %p1372_p2 }
  0x50   :  { %1382 = shalt.err (!%p1379_p6)
}
  0x51   :  { %86 = dma.hbm_to_vmem [thread:$0]  %s1707_s5, 1024, %s81_s24, [#allocation9], %s1479_s29, %s1479_s29, %s1480_s30  }
  0x52   :  { %s1391_s2 = scalar_lea.vmem %s109_s27, 1024  ;;  %p1396_p8 = scmp.lt.s32.totalorder %s109_s27, %s109_s27 }
  0x53   :  { %p1392_p7 = scmp.ne.s32.totalorder %s109_s27, %s1391_s2  ;;  %p1397_p9 = scmp.lt.s32.totalorder %s1391_s2, %s1391_s2 }
  0x55   :  { %p1398_p10 = por %p1397_p9, %p1396_p8 }
  0x57   :  { %p1399_p11 = pnand %p1398_p10, %p1392_p7 }
  0x59   :  { %1402 = shalt.err (!%p1399_p11)
}
  0x5a   :  { %114 = dma.hbm_to_vmem [thread:$0]  %s1711_s9, 1024, %s109_s27, [#allocation12], %s1479_s29, %s1479_s29, %s1480_s30  }
  0x5b   :  { %s1489_s18 = smov [#allocation16]  }
  0x5c   :  { %s136_s7 = sshll.u32 %s1489_s18, 4  ;;  %s137_s7 = int_to_ptr.vmem [resolvable:$true] %s136_s7 }
  0x5d   :  { %s1411_s19 = scalar_lea.vmem %s137_s7, 1024  ;;  %p1416_p13 = scmp.lt.s32.totalorder %s137_s7, %s137_s7 }
  0x5e   :  { %p1412_p12 = scmp.ne.s32.totalorder %s137_s7, %s1411_s19  ;;  %p1417_p0 = scmp.lt.s32.totalorder %s1411_s19, %s1411_s19 }
  0x60   :  { %p1418_p1 = por %p1417_p0, %p1416_p13 }
  0x62   :  { %p1419_p2 = pnand %p1418_p1, %p1412_p12 }
  0x64   :  { %1422 = shalt.err (!%p1419_p2)
}
  0x65   :  { %142 = dma.hbm_to_vmem [thread:$0]  %s1715_s13, 1024, %s137_s7, [#allocation15], %s1479_s29, %s1479_s29, %s1480_s30  }
  0x66   :  { %1463 = dma.done.wait [#allocation3], 64  }
  0x67   :  { %1464 = vsyncadd [#allocation3], 4294967232 }
  0x68   :  { %1465 = dma.done.wait [#allocation6], 640  }
  0x69   :  { %1466 = vsyncadd [#allocation6], 4294966656 }
  0x6a   :  { %1467 = dma.done.wait [#allocation9], 2048  }
  0x6b   :  { %1468 = vsyncadd [#allocation9], 4294965248 }
  0x6c   :  { %1469 = dma.done.wait [#allocation12], 3072  }
  0x6d   :  { %1470 = vsyncadd [#allocation12], 4294964224 }
  0x6e   :  { %1471 = dma.done.wait [#allocation15], 2048  }
  0x6f   :  { %1472 = vsyncadd [#allocation15], 4294965248  ;;  %v1490_v0 = vmov 0.0   ;;  %vm1491_vm0 = vmmov 0   ;;  %v1173_v1 = vld [vmem:[#allocation8 + $0x38] sm:$0xff]   ;;  %v1174_v2 = vld [vmem:[#allocation8 + $0x30] sm:$0xff]  }
  0x70   :  { %1055 = vmatprep.subr.bf16.mxu0 %v1490_v0  ;;  %1071 = vmatprep.mubr.msk.bf16.mxu0 %vm1491_vm0, %v1490_v0  ;;  %v1175_v3 = vld [vmem:[#allocation8 + $0x28] sm:$0xff]   ;;  %v1181_v4 = vld [vmem:[#allocation10 + $0x38] sm:$0xff]   ;;  %v1176_v5 = vld [vmem:[#allocation8 + $0x20] sm:$0xff]   ;;  %v1492_v44 = vmov 0  }
  0x71   :  { %1075 = vmatprep.subr.bf16.mxu1 %v1490_v0  ;;  %1091 = vmatprep.mubr.msk.bf16.mxu1 %vm1491_vm0, %v1490_v0  ;;  %v1182_v6 = vld [vmem:[#allocation10 + $0x30] sm:$0xff]   ;;  %v1177_v7 = vld [vmem:[#allocation8 + $0x18] sm:$0xff]   ;;  %v1183_v8 = vld [vmem:[#allocation10 + $0x28] sm:$0xff]  }
  0x72   :  { %1056 = vmatpush3.bf16.msra.mxu0 %v1173_v1  ;;  %1076 = vmatpush3.bf16.msra.mxu1 %v1181_v4  ;;  %v1178_v9 = vld [vmem:[#allocation8 + $0x10] sm:$0xff]   ;;  %v1184_v10 = vld [vmem:[#allocation10 + $0x20] sm:$0xff]   ;;  %v1179_v11 = vld [vmem:[#allocation8 + $0x8] sm:$0xff]  }
  0x73   :  { %1057 = vmatprep.subr.bf16.mxu0 %v1490_v0  ;;  %1077 = vmatprep.subr.bf16.mxu1 %v1490_v0  ;;  %v1185_v12 = vld [vmem:[#allocation10 + $0x18] sm:$0xff]   ;;  %v1180_v13 = vld [vmem:[#allocation8] sm:$0xff]   ;;  %v1186_v14 = vld [vmem:[#allocation10 + $0x10] sm:$0xff]  }
  0x74   :  { %v173_v15 = vld [vmem:[#allocation2] sm:$0xf]  ;;  %v1187_v16 = vld [vmem:[#allocation10 + $0x8] sm:$0xff]   ;;  %v1188_v17 = vld [vmem:[#allocation10] sm:$0xff]  }
  0x75   :  { %v1189_v18 = vld [vmem:[#allocation11 + $0x70] ss:$8 sps:$4 sm:$0xff]   ;;  %v1191_v19 = vld [vmem:[#allocation11 + $0x74] ss:$8 sps:$4 sm:$0xff]   ;;  %v1194_v20 = vld [vmem:[#allocation11 + $0x64] ss:$8 sps:$4 sm:$0xff]  }
  0x76   :  { %1058 = vmatpush3.bf16.msra.mxu0 %v1174_v2  ;;  %1078 = vmatpush3.bf16.msra.mxu1 %v1182_v6  ;;  %v1192_v21 = vld [vmem:[#allocation11 + $0x60] ss:$8 sps:$4 sm:$0xff]   ;;  %v1197_v22 = vld [vmem:[#allocation11 + $0x54] ss:$8 sps:$4 sm:$0xff]   ;;  %v1195_v23 = vld [vmem:[#allocation11 + $0x50] ss:$8 sps:$4 sm:$0xff]   ;;  %v423_v6 = vlaneseq }
  0x77   :  { %1059 = vmatprep.subr.bf16.mxu0 %v1490_v0  ;;  %1079 = vmatprep.subr.bf16.mxu1 %v1490_v0  ;;  %v1200_v24 = vld [vmem:[#allocation11 + $0x44] ss:$8 sps:$4 sm:$0xff]   ;;  %v1198_v25 = vld [vmem:[#allocation11 + $0x40] ss:$8 sps:$4 sm:$0xff]   ;;  %v1203_v26 = vld [vmem:[#allocation11 + $0x34] ss:$8 sps:$4 sm:$0xff]  }
  0x78   :  { %v1201_v27 = vld [vmem:[#allocation11 + $0x30] ss:$8 sps:$4 sm:$0xff]   ;;  %v1206_v28 = vld [vmem:[#allocation11 + $0x24] ss:$8 sps:$4 sm:$0xff]   ;;  %v1204_v29 = vld [vmem:[#allocation11 + $0x20] ss:$8 sps:$4 sm:$0xff]  }
  0x79   :  { %v948_v30 = vld [vmem:[%s1706_s4] ss:$0 sm:$0xff]  ;;  %v286_v33 = vld [vmem:[#allocation7] sm:$0xff]  ;;  %v1207_v41 = vld [vmem:[#allocation11 + $0x10] ss:$8 sps:$4 sm:$0xff]  }
  0x7a   :  { %1060 = vmatpush3.bf16.msra.mxu0 %v1175_v3  ;;  %1080 = vmatpush3.bf16.msra.mxu1 %v1183_v8  ;;  %v1209_v40 = vld [vmem:[#allocation11 + $0x14] ss:$8 sps:$4 sm:$0xff]   ;;  %v1212_v42 = vld [vmem:[#allocation11 + $0x4] ss:$8 sps:$4 sm:$0xff]   ;;  %v1210_v43 = vld [vmem:[#allocation11] ss:$8 sps:$4 sm:$0xff]  }
  0x7b   :  { %1061 = vmatprep.subr.bf16.mxu0 %v1490_v0  ;;  %1081 = vmatprep.subr.bf16.mxu1 %v1490_v0  ;;  %v957_v45 = vld [vmem:[%s1708_s6] ss:$0 sm:$0xff]  ;;  %v402_v48 = vld [vmem:[#allocation7 + $0x8] sm:$0xff]  ;;  %v1213_v55 = vld [vmem:[#allocation13 + $0x38] sm:$0xff]  }
  0x7c   :  { %v1214_v56 = vld [vmem:[#allocation13 + $0x30] sm:$0xff]   ;;  %v1215_v57 = vld [vmem:[#allocation13 + $0x28] sm:$0xff]   ;;  %v1216_v58 = vld [vmem:[#allocation13 + $0x20] sm:$0xff]  }
  0x7d   :  { %v1217_v59 = vld [vmem:[#allocation13 + $0x18] sm:$0xff]   ;;  %v1218_v60 = vld [vmem:[#allocation13 + $0x10] sm:$0xff]   ;;  %v1219_v61 = vld [vmem:[#allocation13 + $0x8] sm:$0xff]  }
  0x7e   :  { %1062 = vmatpush3.bf16.msra.mxu0 %v1176_v5  ;;  %1082 = vmatpush3.bf16.msra.mxu1 %v1184_v10  ;;  %v1220_v62 = vld [vmem:[#allocation13] sm:$0xff]   ;;  %v1221_v63 = vld [vmem:[#allocation14 + $0x38] sm:$0xff]   ;;  %v1222_v1 = vld [vmem:[#allocation14 + $0x30] sm:$0xff]  }
  0x7f   :  { %1063 = vmatprep.subr.bf16.mxu0 %v1490_v0  ;;  %1083 = vmatprep.subr.bf16.mxu1 %v1490_v0  ;;  %v1223_v2 = vld [vmem:[#allocation14 + $0x28] sm:$0xff]   ;;  %v1224_v3 = vld [vmem:[#allocation14 + $0x20] sm:$0xff]   ;;  %v1225_v4 = vld [vmem:[#allocation14 + $0x18] sm:$0xff]  }
  0x80   :  { %v1226_v5 = vld [vmem:[#allocation14 + $0x10] sm:$0xff]  }
  0x82   :  { %1064 = vmatpush3.bf16.msra.mxu0 %v1177_v7  ;;  %1084 = vmatpush3.bf16.msra.mxu1 %v1185_v12  ;;  %v424_v7 = vshrl.u32 %v423_v6, 7 }
  0x83   :  { %1065 = vmatprep.subr.bf16.mxu0 %v1490_v0  ;;  %1085 = vmatprep.subr.bf16.mxu1 %v1490_v0 }
  0x84   :  { %v425_v8 = vsub.s32 0, %v424_v7  ;;  %v429_v10 = vsub.s32 1, %v424_v7 }
  0x86   :  { %1066 = vmatpush3.bf16.msra.mxu0 %v1178_v9  ;;  %1086 = vmatpush3.bf16.msra.mxu1 %v1186_v14  ;;  %v421_v9 = vld [vmem:[%s1710_s8] sm:$0x3] }
  0x87   :  { %1067 = vmatprep.subr.bf16.mxu0 %v1490_v0  ;;  %1087 = vmatprep.subr.bf16.mxu1 %v1490_v0  ;;  %v430_v12 = vrot.slane %v421_v9, %v429_v10 }
  0x8a   :  { %1068 = vmatpush3.bf16.msra.mxu0 %v1179_v11  ;;  %1088 = vmatpush3.bf16.msra.mxu1 %v1187_v16  ;;  %v426_v11 = vrot.slane %v421_v9, %v425_v8 }
  0x8b   :  { %1069 = vmatprep.subr.bf16.mxu0 %v1490_v0  ;;  %1089 = vmatprep.subr.bf16.mxu1 %v1490_v0 }
  0x8e   :  { %1070 = vmatpush3.bf16.msra.mxu0 %v1180_v13  ;;  %1090 = vmatpush3.bf16.msra.mxu1 %v1188_v17 }
  0x8f   :  { %1095 = vmatprep.subr.bf16.mxu1 %v1490_v0  ;;  %513 = vmatprep.subr.bf16.mxu0 %v1191_v19 }
  0x91   :  { %1072 = vmatmul.mubr.bf16.vlgmr.msra.gmra.mxu0 %v173_v15 }
  0x92   :  { %514 = vmatpush1.bf16.msra.mxu0 %v1189_v18  ;;  %545 = vmatprep.mubr.bf16.mxu0 %v1492_v44 }
  0x93   :  { %515 = vmatprep.subr.bf16.mxu0 %v1194_v20 }
  0x96   :  { %516 = vmatpush1.bf16.msra.mxu0 %v1192_v21 }
  0x97   :  { %517 = vmatprep.subr.bf16.mxu0 %v1197_v22 }
  0x9a   :  { %518 = vmatpush1.bf16.msra.mxu0 %v1195_v23  ;;  %v556_v23 = vld [vmem:[#allocation5] sm:$0xff] }
  0x9b   :  { %519 = vmatprep.subr.bf16.mxu0 %v1200_v24 }
  0x9e   :  { %520 = vmatpush1.bf16.msra.mxu0 %v1198_v25 }
  0x9f   :  { %521 = vmatprep.subr.bf16.mxu0 %v1203_v26 }
  0xa2   :  { %522 = vmatpush1.bf16.msra.mxu0 %v1201_v27 }
  0xa3   :  { %523 = vmatprep.subr.bf16.mxu0 %v1206_v28  ;;  %v1227_v28 = vld [vmem:[#allocation14 + $0x8] sm:$0xff]  }
  0xa6   :  { %524 = vmatpush1.bf16.msra.mxu0 %v1204_v29  ;;  %v1228_v29 = vld [vmem:[#allocation14] sm:$0xff]  }
  0xa7   :  { %525 = vmatprep.subr.bf16.mxu0 %v1209_v40 }
  0xaa   :  { %526 = vmatpush1.bf16.msra.mxu0 %v1207_v41 }
  0xab   :  { %527 = vmatprep.subr.bf16.mxu0 %v1212_v42 }
  0xae   :  { %528 = vmatpush1.bf16.msra.mxu0 %v1210_v43 }
  0xaf   :  { %1115 = vmatprep.subr.bf16.mxu0 %v1490_v0 }
 0x151   :  { %v279_v31 = vpop.f32.mrf.mxu0 }
 0x152   :  { %v280_v32 = vadd.f32 %v948_v30, %v279_v31  ;;  %v1229_v30 = vld [vmem:[#allocation16 + $0x38] sm:$0xff]   ;;  %v1230_v31 = vld [vmem:[#allocation16 + $0x30] sm:$0xff]  }
 0x153   :  { %v1073_v34 = vpop.f32.mrf.mxu0 }
 0x154   :  { %v285_v35 = vmax.f32 %v280_v32, 0.0  ;;  %v1231_v32 = vld [vmem:[#allocation16 + $0x28] sm:$0xff]   ;;  %v1233_v34 = vld [vmem:[#allocation16 + $0x18] sm:$0xff]  }
 0x155   :  { %v282_v36 = vpop.f32.mrf.mxu0 }
 0x156   :  { %v287_v37 = vmul.f32 %v286_v33, %v285_v35  ;;  %v1232_v33 = vld [vmem:[#allocation16 + $0x20] sm:$0xff]   ;;  %v1234_v35 = vld [vmem:[#allocation16 + $0x10] sm:$0xff]  }
 0x157   :  { %v1074_v38 = vpop.f32.mrf.mxu0  ;;  %v982_v36 = vld [vmem:[%s1712_s10] ss:$0 sm:$0xff]  ;;  %s1493_s10 = smov [#allocation18]  }
 0x158   :  { %v288_v39 = vpack.c.bf16 %v287_v37, %v287_v37  ;;  %s931_s1 = sshll.u32 %s1493_s10, 4  ;;  %s932_s1 = int_to_ptr.vmem [resolvable:$true] %s931_s1 }
 0x159   :  { %s1423_s3 = scalar_lea.vmem %s932_s1, 256  ;;  %p1428_p4 = scmp.lt.s32.totalorder %s932_s1, %s932_s1 }
 0x15a   :  { %1092 = vmatmul.mubr.bf16.vlgmr.msra.gmra.mxu1 %v288_v39  ;;  %v676_v39 = vld [vmem:[#allocation7 + $0x10] sm:$0xff]  ;;  %p1424_p3 = scmp.ne.s32.totalorder %s932_s1, %s1423_s3  ;;  %p1429_p5 = scmp.lt.s32.totalorder %s1423_s3, %s1423_s3 }
 0x15b   :  { %1111 = vmatprep.mubr.msk.bf16.mxu1 %vm1491_vm0, %v1490_v0  ;;  %1096 = vmatpush3.bf16.msra.mxu1 %v1213_v55 }
 0x15c   :  { %1097 = vmatprep.subr.bf16.mxu1 %v1490_v0  ;;  %p1430_p6 = por %p1429_p5, %p1428_p4 }
 0x15e   :  { %p1431_p7 = pnand %p1430_p6, %p1424_p3 }
 0x15f   :  { %1098 = vmatpush3.bf16.msra.mxu1 %v1214_v56 }
 0x160   :  { %1099 = vmatprep.subr.bf16.mxu1 %v1490_v0 }
 0x163   :  { %1100 = vmatpush3.bf16.msra.mxu1 %v1215_v57 }
 0x164   :  { %1101 = vmatprep.subr.bf16.mxu1 %v1490_v0 }
 0x167   :  { %1102 = vmatpush3.bf16.msra.mxu1 %v1216_v58 }
 0x168   :  { %1103 = vmatprep.subr.bf16.mxu1 %v1490_v0 }
 0x16b   :  { %1104 = vmatpush3.bf16.msra.mxu1 %v1217_v59 }
 0x16c   :  { %1105 = vmatprep.subr.bf16.mxu1 %v1490_v0 }
 0x16f   :  { %1106 = vmatpush3.bf16.msra.mxu1 %v1218_v60 }
 0x170   :  { %1107 = vmatprep.subr.bf16.mxu1 %v1490_v0 }
 0x173   :  { %1108 = vmatpush3.bf16.msra.mxu1 %v1219_v61 }
 0x174   :  { %1109 = vmatprep.subr.bf16.mxu1 %v1490_v0 }
 0x177   :  { %1110 = vmatpush3.bf16.msra.mxu1 %v1220_v62 }
 0x178   :  { %1135 = vmatprep.subr.bf16.mxu1 %v1490_v0 }
 0x21a   :  { %v394_v46 = vpop.f32.mrf.mxu1 }
 0x21b   :  { %v395_v47 = vadd.f32 %v957_v45, %v394_v46  ;;  %v1235_v46 = vld [vmem:[#allocation16 + $0x8] sm:$0xff]  }
 0x21c   :  { %v1093_v49 = vpop.f32.mrf.mxu1 }
 0x21d   :  { %v400_v50 = vmax.f32 %v395_v47, 0.0  ;;  %v1236_v47 = vld [vmem:[#allocation16] sm:$0xff]  }
 0x21e   :  { %v397_v51 = vpop.f32.mrf.mxu1 }
 0x21f   :  { %v403_v52 = vmul.f32 %v402_v48, %v400_v50  ;;  %v991_v48 = vld [vmem:[%s1714_s12] ss:$0 sm:$0xff]  ;;  %v792_v51 = vld [vmem:[#allocation7 + $0x18] sm:$0xff] }
 0x220   :  { %v1094_v53 = vpop.f32.mrf.mxu1 }
 0x221   :  { %v404_v54 = vpack.c.bf16 %v403_v52, %v403_v52 }
 0x223   :  { %546 = vmatmul.mubr.bf16.vlgmr.msra.gmra.mxu0 %v404_v54 }
 0x224   :  { %1131 = vmatprep.mubr.msk.bf16.mxu0 %vm1491_vm0, %v1490_v0  ;;  %1116 = vmatpush3.bf16.msra.mxu0 %v1221_v63 }
 0x225   :  { %1117 = vmatprep.subr.bf16.mxu0 %v1490_v0 }
 0x228   :  { %1118 = vmatpush3.bf16.msra.mxu0 %v1222_v1 }
 0x229   :  { %1119 = vmatprep.subr.bf16.mxu0 %v1490_v0 }
 0x22c   :  { %1120 = vmatpush3.bf16.msra.mxu0 %v1223_v2 }
 0x22d   :  { %1121 = vmatprep.subr.bf16.mxu0 %v1490_v0 }
 0x230   :  { %1122 = vmatpush3.bf16.msra.mxu0 %v1224_v3 }
 0x231   :  { %1123 = vmatprep.subr.bf16.mxu0 %v1490_v0 }
 0x234   :  { %1124 = vmatpush3.bf16.msra.mxu0 %v1225_v4 }
 0x235   :  { %1125 = vmatprep.subr.bf16.mxu0 %v1490_v0 }
 0x238   :  { %1126 = vmatpush3.bf16.msra.mxu0 %v1226_v5 }
 0x239   :  { %1127 = vmatprep.subr.bf16.mxu0 %v1490_v0 }
 0x23c   :  { %1128 = vmatpush3.bf16.msra.mxu0 %v1227_v28 }
 0x23d   :  { %1129 = vmatprep.subr.bf16.mxu0 %v1490_v0 }
 0x240   :  { %1130 = vmatpush3.bf16.msra.mxu0 %v1228_v29 }
 0x2e3   :  { %v547_v13 = vpop.f32.mrf.mxu0 }
 0x2e4   :  { %v548_v14 = vadd.f32 %v547_v13, %v426_v11 }
 0x2e5   :  { %v549_v15 = vpop.f32.mrf.mxu0 }
 0x2e6   :  { %v554_v16 = vmax.f32 %v548_v14, 0.0  ;;  %v550_v17 = vadd.f32 %v549_v15, %v430_v12 }
 0x2e7   :  { %v551_v18 = vpop.f32.mrf.mxu0 }
 0x2e8   :  { %913 = vst [vmem:[#allocation18] sm:$0xff] %v554_v16  ;;  %v555_v19 = vmax.f32 %v550_v17, 0.0 }
 0x2e9   :  { %v552_v20 = vpop.f32.mrf.mxu0 }
 0x2ea   :  { %v557_v21 = vmul.f32 0.5, %v555_v19  ;;  %914 = vst [vmem:[#allocation18 + $0x8] sm:$0xff] %v555_v19 }
 0x2ec   :  { %v558_v22 = vmul.f32 1.442695, %v557_v21 }
 0x2ee   :  { %1237 = vpow2.f32 %v558_v22 }
 0x2fb   :  { %v1238_v24 = vpop.eup %1237 }
 0x2fc   :  { %v560_v25 = vmul.f32 %v1238_v24, %v556_v23 }
 0x2fe   :  { %v561_v26 = vadd.f32 %v560_v25, %v554_v16 }
 0x300   :  { %v562_v27 = vpack.c.bf16 %v561_v26, %v561_v26 }
 0x302   :  { %1112 = vmatmul.mubr.bf16.vlgmr.msra.gmra.mxu1 %v562_v27 }
 0x303   :  { %1151 = vmatprep.mubr.msk.bf16.mxu1 %vm1491_vm0, %v1490_v0  ;;  %1136 = vmatpush3.bf16.msra.mxu1 %v1229_v30 }
 0x304   :  { %1137 = vmatprep.subr.bf16.mxu1 %v1490_v0 }
 0x307   :  { %1138 = vmatpush3.bf16.msra.mxu1 %v1230_v31 }
 0x308   :  { %1139 = vmatprep.subr.bf16.mxu1 %v1490_v0 }
 0x30b   :  { %1140 = vmatpush3.bf16.msra.mxu1 %v1231_v32 }
 0x30c   :  { %1141 = vmatprep.subr.bf16.mxu1 %v1490_v0 }
 0x30f   :  { %1142 = vmatpush3.bf16.msra.mxu1 %v1232_v33 }
 0x310   :  { %1143 = vmatprep.subr.bf16.mxu1 %v1490_v0 }
 0x313   :  { %1144 = vmatpush3.bf16.msra.mxu1 %v1233_v34 }
 0x314   :  { %1145 = vmatprep.subr.bf16.mxu1 %v1490_v0 }
 0x317   :  { %1146 = vmatpush3.bf16.msra.mxu1 %v1234_v35 }
 0x318   :  { %1147 = vmatprep.subr.bf16.mxu1 %v1490_v0 }
 0x31b   :  { %1148 = vmatpush3.bf16.msra.mxu1 %v1235_v46 }
 0x31c   :  { %1149 = vmatprep.subr.bf16.mxu1 %v1490_v0 }
 0x31f   :  { %1150 = vmatpush3.bf16.msra.mxu1 %v1236_v47 }
 0x3c2   :  { %v668_v37 = vpop.f32.mrf.mxu1 }
 0x3c3   :  { %v669_v38 = vadd.f32 %v982_v36, %v668_v37 }
 0x3c4   :  { %v1113_v40 = vpop.f32.mrf.mxu1 }
 0x3c5   :  { %v674_v41 = vmax.f32 %v669_v38, 0.0 }
 0x3c6   :  { %v671_v42 = vpop.f32.mrf.mxu1 }
 0x3c7   :  { %v677_v43 = vmul.f32 %v676_v39, %v674_v41 }
 0x3c8   :  { %v1114_v44 = vpop.f32.mrf.mxu1 }
 0x3c9   :  { %v678_v45 = vpack.c.bf16 %v677_v43, %v677_v43 }
 0x3cb   :  { %1132 = vmatmul.mubr.bf16.vlgmr.msra.gmra.mxu0 %v678_v45 }
 0x48b   :  { %v784_v49 = vpop.f32.mrf.mxu0 }
 0x48c   :  { %v785_v50 = vadd.f32 %v991_v48, %v784_v49 }
 0x48d   :  { %v1133_v52 = vpop.f32.mrf.mxu0 }
 0x48e   :  { %v790_v53 = vmax.f32 %v785_v50, 0.0 }
 0x48f   :  { %v787_v54 = vpop.f32.mrf.mxu0 }
 0x490   :  { %v793_v55 = vmul.f32 %v792_v51, %v790_v53 }
 0x491   :  { %v1134_v56 = vpop.f32.mrf.mxu0 }
 0x492   :  { %v794_v57 = vpack.c.bf16 %v793_v55, %v793_v55 }
 0x494   :  { %1152 = vmatmul.mubr.bf16.vlgmr.msra.gmra.mxu1 %v794_v57 }
 0x495   :  { %1434 = shalt.err (!%p1431_p7)
}
 0x496   :  { %934 = dma.vmem_to_hbm [thread:$0]  %s932_s1, 256, %s1718_s16, [#allocation19]   ;;  %v1000_v0 = vld [vmem:[%s1716_s14] ss:$0 sm:$0xff] }
 0x497   :  { %s1494_s28 = smov [#allocation17]  }
 0x498   :  { %s921_s0 = sshll.u32 %s1494_s28, 4  ;;  %s922_s0 = int_to_ptr.vmem [resolvable:$true] %s921_s0 }
 0x499   :  { %s1443_s16 = scalar_lea.vmem %s922_s0, 128  ;;  %p1448_p9 = scmp.lt.s32.totalorder %s922_s0, %s922_s0 }
 0x49a   :  { %p1444_p8 = scmp.ne.s32.totalorder %s922_s0, %s1443_s16  ;;  %p1449_p10 = scmp.lt.s32.totalorder %s1443_s16, %s1443_s16 }
 0x49c   :  { %p1450_p11 = por %p1449_p10, %p1448_p9 }
 0x49e   :  { %p1451_p12 = pnand %p1450_p11, %p1444_p8 }
 0x554   :  { %v900_v58 = vpop.f32.mrf.mxu1 }
 0x555   :  { %v901_v59 = vadd.f32 %v1000_v0, %v900_v58 }
 0x556   :  { %v1153_v60 = vpop.f32.mrf.mxu1 }
 0x557   :  { %v1009_v61 = vmul.f32 -1.442695, %v901_v59 }
 0x558   :  { %v903_v62 = vpop.f32.mrf.mxu1 }
 0x559   :  { %1239 = vpow2.f32 %v1009_v61 }
 0x55a   :  { %v1154_v63 = vpop.f32.mrf.mxu1 }
 0x566   :  { %v1240_v1 = vpop.eup %1239 }
 0x567   :  { %v909_v2 = vadd.f32 1.0, %v1240_v1 }
 0x569   :  { %1241 = vrcp.f32 %v909_v2 }
 0x576   :  { %v1242_v3 = vpop.eup %1241 }
 0x577   :  { %912 = vst [vmem:[#allocation17] sm:$0xff] %v1242_v3 }
 0x578   :  { %1454 = shalt.err (!%p1451_p12)
}
 0x579   :  { %924 = dma.vmem_to_hbm [thread:$0]  %s922_s0, 128, %s1717_s15, [#allocation4]  }
 0x57a   :  { %1473 = dma.done.wait [#allocation4], 128  }
 0x57b   :  { %1474 = vsyncadd [#allocation4], 4294967168 }
 0x57c   :  { %1475 = dma.done.wait [#allocation19], 256  }
 0x57d   :  { %1476 = vsyncadd [#allocation19], 4294967040 }
 0x57e   :  { %941 = vsyncpa [#allocation3], 1 }
 0x57f   :  { %942 = vsyncpa [#allocation6], 1 }
 0x580   :  { %943 = vsyncpa [#allocation9], 1 }
 0x581   :  { %944 = vsyncpa [#allocation12], 1 }
 0x582   :  { %945 = vsyncpa [#allocation15], 1 }
 0x583   :  { %946 = vsyncpa [#allocation4], 1 }
 0x584   :  { %947 = vsyncpa [#allocation19], 1 }

</bundles_post_ra>
